<compile_context>
chip_gen: v7x
topology: tpu7x:2x2x1
jax: 0.10.0
libtpu: 0.0.40
codegen_flags: <defaults>
</compile_context>

<pallas_src>
import functools

import jax
import jax.numpy as jnp
import numpy as np
from jax.experimental import pallas as pl
from jax.experimental.pallas import tpu as pltpu


# ---------------------------------------------------------------------------
# Pallas kernel: one batch element per grid step, NCT layout, no scratch.
# ---------------------------------------------------------------------------
def _model0_kernel(x_ref, wp_ref, bp_ref, w0_ref, b0_ref, wdw_ref, bdw_ref,
                   wse1_ref, bse1_ref, wse2_ref, bse2_ref, w3_ref, b3_ref,
                   out_ref, *, T, PAD, K, DIL):
    x = x_ref[0]                                          # (Cin, T) f32

    def mm(w_ref, a):
        # 1x1 conv == channel matmul on the MXU. Weights may be bf16 (v6e/v7x path);
        # always accumulate in f32.
        return jnp.dot(w_ref[...], a.astype(w_ref.dtype),
                       preferred_element_type=jnp.float32)

    # prev_conv
    h = mm(wp_ref, x) + bp_ref[...]                       # (Cin, T)

    # layer[0]: 1x1 conv + SiLU
    u = mm(w0_ref, h) + b0_ref[...]                       # (Cexp, T)
    u = u * jax.nn.sigmoid(u)

    # layer[1]: causal depthwise conv (groups=Cexp, stride=1, dilation=DIL) + SiLU.
    # Register-resident left pad: time is the lane axis, so the K shifted windows are
    # static lane slices of the padded activation — no VMEM pad scratch.
    cexp = u.shape[0]
    if PAD > 0:
        u_pad = jnp.concatenate(
            [jnp.zeros((cexp, PAD), jnp.float32), u], axis=1)   # (Cexp, T+PAD)
    else:
        u_pad = u
    wdw = wdw_ref[...]                                    # (Cexp, K), loaded once
    acc = jnp.zeros_like(u)
    for k in range(K):                                    # K static -> fully unrolled
        acc = acc + u_pad[:, k * DIL:k * DIL + T] * wdw[:, k:k + 1]
    y = acc + bdw_ref[...]
    y = y * jax.nn.sigmoid(y)                             # out1

    # layer[2]: 1x1 -> SiLU -> 1x1 -> Sigmoid   (gate, out2)
    g = mm(wse1_ref, y) + bse1_ref[...]                   # (Cexp//4, T)
    g = g * jax.nn.sigmoid(g)
    g = jax.nn.sigmoid(mm(wse2_ref, g) + bse2_ref[...])   # (Cexp, T)

    # layer[3]: 1x1 conv of gated activation + residual with prev_conv output
    out = mm(w3_ref, y * g) + b3_ref[...] + h             # (Cout, T)
    out_ref[0] = out.astype(out_ref.dtype)


def model0_pallas(x_nct, params, *, kernel_size, stride, dilation, padding,
                  matmul_dtype=jnp.float32):
    """x_nct: (B, Cin, T) float32, PyTorch NCT layout.  Returns (B, Cout, T) float32."""
    B, Cin, T = x_nct.shape
    K, DIL, PAD = kernel_size, dilation, padding
    Cexp = params["w0"].shape[0]
    Cred = params["wse1"].shape[0]
    Cout = params["w3"].shape[0]

    # The residual `+ h` only typechecks / is meaningful when:
    assert stride == 1, "residual add requires stride == 1"
    assert PAD == DIL * (K - 1), "residual add requires causal 'same-length' padding"
    assert Cout == Cin, "residual add requires out_channels == in_channels"
    assert Cred == Cexp // 4

    mmd = jnp.dtype(matmul_dtype)
    # Matmul weights in matmul_dtype (bf16 halves weight traffic + 2x MXU on v6e/v7x);
    # depthwise weight and all biases stay f32 (VPU/EUP math stays f32 on every chip).
    wp = params["wp"].astype(mmd)                      # (Cin,  Cin)  torch (out, in)
    w0 = params["w0"].astype(mmd)                      # (Cexp, Cin)
    wse1 = params["wse1"].astype(mmd)                  # (Cred, Cexp)
    wse2 = params["wse2"].astype(mmd)                  # (Cexp, Cred)
    w3 = params["w3"].astype(mmd)                      # (Cout, Cexp)
    wdw = params["wdw"][:, 0, :].astype(jnp.float32)   # (Cexp, K)
    bp = params["bp"][:, None].astype(jnp.float32)
    b0 = params["b0"][:, None].astype(jnp.float32)
    bdw = params["bdw"][:, None].astype(jnp.float32)
    bse1 = params["bse1"][:, None].astype(jnp.float32)
    bse2 = params["bse2"][:, None].astype(jnp.float32)
    b3 = params["b3"][:, None].astype(jnp.float32)

    kernel = functools.partial(_model0_kernel, T=T, PAD=PAD, K=K, DIL=DIL)

    # Advisory cost estimate for the XLA scheduler.
    flops = 2 * B * T * (Cin * Cin + Cin * Cexp + Cexp * K
                         + Cexp * Cred + Cred * Cexp + Cexp * Cout)
    transcendentals = B * T * (3 * Cexp + Cred)
    weight_elems = (Cin * Cin + Cin * Cexp + Cexp * K + 2 * Cexp * Cred
                    + Cexp * Cout + 2 * Cin + 3 * Cexp + Cred + Cout)
    bytes_accessed = 4 * B * T * (Cin + Cout) + 4 * weight_elems

    # VMEM sized to the actual blocks (double-buffered x/out, resident weights, headroom
    # for intermediates), clamped to sane bounds for all of v5e / v6e / v7x.
    vmem_est = 4 * (2 * T * (Cin + Cout) + (T + PAD) * Cexp * 6 + weight_elems)
    vmem_limit = int(min(64 << 20, max(4 << 20, 8 * vmem_est)))

    out = pl.pallas_call(
        kernel,
        out_shape=jax.ShapeDtypeStruct((B, Cout, T), jnp.float32),
        grid_spec=pltpu.PrefetchScalarGridSpec(
            num_scalar_prefetch=0,
            grid=(B,),
            in_specs=[
                pl.BlockSpec((1, Cin, T), lambda b: (b, 0, 0)),    # x
                pl.BlockSpec((Cin, Cin), lambda b: (0, 0)),        # wp
                pl.BlockSpec((Cin, 1), lambda b: (0, 0)),          # bp
                pl.BlockSpec((Cexp, Cin), lambda b: (0, 0)),       # w0
                pl.BlockSpec((Cexp, 1), lambda b: (0, 0)),         # b0
                pl.BlockSpec((Cexp, K), lambda b: (0, 0)),         # wdw
                pl.BlockSpec((Cexp, 1), lambda b: (0, 0)),         # bdw
                pl.BlockSpec((Cred, Cexp), lambda b: (0, 0)),      # wse1
                pl.BlockSpec((Cred, 1), lambda b: (0, 0)),         # bse1
                pl.BlockSpec((Cexp, Cred), lambda b: (0, 0)),      # wse2
                pl.BlockSpec((Cexp, 1), lambda b: (0, 0)),         # bse2
                pl.BlockSpec((Cout, Cexp), lambda b: (0, 0)),      # w3
                pl.BlockSpec((Cout, 1), lambda b: (0, 0)),         # b3
            ],
            out_specs=pl.BlockSpec((1, Cout, T), lambda b: (b, 0, 0)),
        ),
        compiler_params=pltpu.CompilerParams(
            dimension_semantics=("parallel",),
            vmem_limit_bytes=vmem_limit),
        cost_estimate=pl.CostEstimate(flops=flops,
                                      transcendentals=transcendentals,
                                      bytes_accessed=bytes_accessed),
    )(x_nct, wp, bp, w0, b0, wdw, bdw, wse1, bse1, wse2, bse2, w3, b3)
    return out


# ---------------------------------------------------------------------------
# Pure-JAX reference replicating the PyTorch TestModel_0.forward exactly.
# ---------------------------------------------------------------------------
def model0_reference(x_nct, params, *, kernel_size, stride, dilation, padding):
    dn = ("NCH", "OIH", "NCH")

    def conv(x, w, b, *, st=1, dil=1, groups=1, pad_l=0):
        y = jax.lax.conv_general_dilated(
            x, w, window_strides=(st,), padding=[(pad_l, 0)],
            rhs_dilation=(dil,), dimension_numbers=dn,
            feature_group_count=groups,
            precision=jax.lax.Precision.HIGHEST)
        return y + b[None, :, None]

    Cexp = params["w0"].shape[0]
    h = conv(x_nct, params["wp"][:, :, None], params["bp"])
    u = jax.nn.silu(conv(h, params["w0"][:, :, None], params["b0"]))
    u = jnp.pad(u, ((0, 0), (0, 0), (padding, 0)))
    y = jax.nn.silu(conv(u, params["wdw"], params["bdw"],
                         st=stride, dil=dilation, groups=Cexp))
    g = jax.nn.silu(conv(y, params["wse1"][:, :, None], params["bse1"]))
    g = jax.nn.sigmoid(conv(g, params["wse2"][:, :, None], params["bse2"]))
    out = conv(y * g, params["w3"][:, :, None], params["b3"]) + h
    return out


if __name__ == "__main__":
    # Small, self-consistent config. Residual requires Cout == Cin, stride == 1
    # and padding == dilation * (kernel_size - 1). T=128 puts a full lane-dense
    # time axis in the lanes (output stores are unmasked vst).
    B, Cin, Cexp, Cout = 2, 8, 32, 8
    T = 128
    K, STRIDE, DIL = 3, 1, 2
    PAD = DIL * (K - 1)  # = 4

    key = jax.random.PRNGKey(0)
    ks = jax.random.split(key, 13)
    s = 0.1
    params = {
        "wp":   s * jax.random.normal(ks[0], (Cin, Cin), jnp.float32),
        "bp":   s * jax.random.normal(ks[1], (Cin,), jnp.float32),
        "w0":   s * jax.random.normal(ks[2], (Cexp, Cin), jnp.float32),
        "b0":   s * jax.random.normal(ks[3], (Cexp,), jnp.float32),
        "wdw":  s * jax.random.normal(ks[4], (Cexp, 1, K), jnp.float32),
        "bdw":  s * jax.random.normal(ks[5], (Cexp,), jnp.float32),
        "wse1": s * jax.random.normal(ks[6], (Cexp // 4, Cexp), jnp.float32),
        "bse1": s * jax.random.normal(ks[7], (Cexp // 4,), jnp.float32),
        "wse2": s * jax.random.normal(ks[8], (Cexp, Cexp // 4), jnp.float32),
        "bse2": s * jax.random.normal(ks[9], (Cexp,), jnp.float32),
        "w3":   s * jax.random.normal(ks[10], (Cout, Cexp), jnp.float32),
        "b3":   s * jax.random.normal(ks[11], (Cout,), jnp.float32),
    }
    x = jax.random.normal(ks[12], (B, Cin, T), jnp.float32)

    ref = jax.block_until_ready(
        model0_reference(x, params, kernel_size=K, stride=STRIDE,
                         dilation=DIL, padding=PAD))

    # f32 kernel (works on v5e/v6e/v7x), tight tolerance.
    out = model0_pallas(x, params, kernel_size=K, stride=STRIDE,
                        dilation=DIL, padding=PAD)
    out = jax.block_until_ready(out)
    np.testing.assert_allclose(np.asarray(out), np.asarray(ref),
                               rtol=1e-5, atol=1e-5)

    # bf16 matmul-operand fast path (v6e/v7x MXU): f32 accumulation and f32 VPU math,
    # so only bf16 operand rounding shows up -> looser tolerance.
    out_bf16 = model0_pallas(x, params, kernel_size=K, stride=STRIDE,
                             dilation=DIL, padding=PAD,
                             matmul_dtype=jnp.bfloat16)
    out_bf16 = jax.block_until_ready(out_bf16)
    np.testing.assert_allclose(np.asarray(out_bf16), np.asarray(ref),
                               rtol=3e-2, atol=3e-2)

    print("KERNEL_OK")
</pallas_src>

<mosaic_0001>
module attributes {stable_mosaic.version = 11 : i64} {
  func.func @_model0_kernel(%arg0: i32, %arg1: memref<1x8x128xf32, #tpu.memory_space<vmem>>, %arg2: memref<8x8xf32, #tpu.memory_space<vmem>>, %arg3: memref<8x1xf32, #tpu.memory_space<vmem>>, %arg4: memref<32x8xf32, #tpu.memory_space<vmem>>, %arg5: memref<32x1xf32, #tpu.memory_space<vmem>>, %arg6: memref<32x3xf32, #tpu.memory_space<vmem>>, %arg7: memref<32x1xf32, #tpu.memory_space<vmem>>, %arg8: memref<8x32xf32, #tpu.memory_space<vmem>>, %arg9: memref<8x1xf32, #tpu.memory_space<vmem>>, %arg10: memref<32x8xf32, #tpu.memory_space<vmem>>, %arg11: memref<32x1xf32, #tpu.memory_space<vmem>>, %arg12: memref<8x32xf32, #tpu.memory_space<vmem>>, %arg13: memref<8x1xf32, #tpu.memory_space<vmem>>, %arg14: memref<1x8x128xf32, #tpu.memory_space<vmem>>) attributes {dimension_semantics = [#tpu.dimension_semantics<parallel>], iteration_bounds = array<i64: 2>, scalar_prefetch = 0 : i64, scratch_operands = 0 : i64, tpu.core_type = #tpu.core_type<tc>, window_params = [{transform_indices = @transform_0, window_bounds = array<i64: 1, 8, 128>}, {pipeline_mode = #tpu.pipeline_mode<synchronous>, transform_indices = @transform_1, window_bounds = array<i64: 8, 8>}, {pipeline_mode = #tpu.pipeline_mode<synchronous>, transform_indices = @transform_2, window_bounds = array<i64: 8, 1>}, {pipeline_mode = #tpu.pipeline_mode<synchronous>, transform_indices = @transform_3, window_bounds = array<i64: 32, 8>}, {pipeline_mode = #tpu.pipeline_mode<synchronous>, transform_indices = @transform_4, window_bounds = array<i64: 32, 1>}, {pipeline_mode = #tpu.pipeline_mode<synchronous>, transform_indices = @transform_5, window_bounds = array<i64: 32, 3>}, {pipeline_mode = #tpu.pipeline_mode<synchronous>, transform_indices = @transform_6, window_bounds = array<i64: 32, 1>}, {pipeline_mode = #tpu.pipeline_mode<synchronous>, transform_indices = @transform_7, window_bounds = array<i64: 8, 32>}, {pipeline_mode = #tpu.pipeline_mode<synchronous>, transform_indices = @transform_8, window_bounds = array<i64: 8, 1>}, {pipeline_mode = #tpu.pipeline_mode<synchronous>, transform_indices = @transform_9, window_bounds = array<i64: 32, 8>}, {pipeline_mode = #tpu.pipeline_mode<synchronous>, transform_indices = @transform_10, window_bounds = array<i64: 32, 1>}, {pipeline_mode = #tpu.pipeline_mode<synchronous>, transform_indices = @transform_11, window_bounds = array<i64: 8, 32>}, {pipeline_mode = #tpu.pipeline_mode<synchronous>, transform_indices = @transform_12, window_bounds = array<i64: 8, 1>}, {transform_indices = @transform_13, window_bounds = array<i64: 1, 8, 128>}]} {
    %c0 = arith.constant 0 : index
    %c0_0 = arith.constant 0 : index
    %c0_1 = arith.constant 0 : index
    %0 = vector.load %arg1[%c0, %c0_0, %c0_1] : memref<1x8x128xf32, #tpu.memory_space<vmem>>, vector<1x8x128xf32>
    %1 = vector.shape_cast %0 : vector<1x8x128xf32> to vector<8x128xf32>
    %c0_2 = arith.constant 0 : index
    %c0_3 = arith.constant 0 : index
    %2 = vector.load %arg2[%c0_2, %c0_3] : memref<8x8xf32, #tpu.memory_space<vmem>>, vector<8x8xf32>
    %cst = arith.constant dense<0.000000e+00> : vector<8x128xf32>
    %3 = tpu.matmul %2, %1, %cst {dimension_numbers = #tpu.dot_dimension_numbers<[1], [0], [0], [1], [0, 0, 1, 1], [], []>} : vector<8x8xf32>, vector<8x128xf32>, vector<8x128xf32> -> vector<8x128xf32>
    %c0_4 = arith.constant 0 : index
    %c0_5 = arith.constant 0 : index
    %4 = vector.load %arg3[%c0_4, %c0_5] : memref<8x1xf32, #tpu.memory_space<vmem>>, vector<8x1xf32>
    %5 = vector.broadcast %4 : vector<8x1xf32> to vector<8x128xf32>
    %6 = arith.addf %3, %5 : vector<8x128xf32>
    %c0_6 = arith.constant 0 : index
    %c0_7 = arith.constant 0 : index
    %7 = vector.load %arg4[%c0_6, %c0_7] : memref<32x8xf32, #tpu.memory_space<vmem>>, vector<32x8xf32>
    %cst_8 = arith.constant dense<0.000000e+00> : vector<32x128xf32>
    %8 = tpu.matmul %7, %6, %cst_8 {dimension_numbers = #tpu.dot_dimension_numbers<[1], [0], [0], [1], [0, 0, 1, 1], [], []>} : vector<32x8xf32>, vector<8x128xf32>, vector<32x128xf32> -> vector<32x128xf32>
    %c0_9 = arith.constant 0 : index
    %c0_10 = arith.constant 0 : index
    %9 = vector.load %arg5[%c0_9, %c0_10] : memref<32x1xf32, #tpu.memory_space<vmem>>, vector<32x1xf32>
    %10 = vector.broadcast %9 : vector<32x1xf32> to vector<32x128xf32>
    %11 = arith.addf %8, %10 : vector<32x128xf32>
    %12 = arith.negf %11 : vector<32x128xf32>
    %13 = math.exp %12 : vector<32x128xf32>
    %cst_11 = arith.constant 1.000000e+00 : f32
    %14 = vector.broadcast %cst_11 : f32 to vector<32x128xf32>
    %15 = arith.addf %14, %13 : vector<32x128xf32>
    %16 = arith.divf %14, %15 : vector<32x128xf32>
    %17 = arith.mulf %11, %16 : vector<32x128xf32>
    %cst_12 = arith.constant 0.000000e+00 : f32
    %18 = vector.broadcast %cst_12 : f32 to vector<32x4xf32>
    %19 = tpu.concatenate %18, %17 in 1 : vector<32x4xf32>, vector<32x128xf32> -> vector<32x132xf32>
    %c0_13 = arith.constant 0 : index
    %c0_14 = arith.constant 0 : index
    %20 = vector.load %arg6[%c0_13, %c0_14] : memref<32x3xf32, #tpu.memory_space<vmem>>, vector<32x3xf32>
    %cst_15 = arith.constant 0.000000e+00 : f32
    %21 = vector.broadcast %cst_15 : f32 to vector<32x128xf32>
    %22 = vector.extract_strided_slice %19 {offsets = [0, 0], sizes = [32, 128], strides = [1, 1]} : vector<32x132xf32> to vector<32x128xf32>
    %23 = vector.extract_strided_slice %20 {offsets = [0, 0], sizes = [32, 1], strides = [1, 1]} : vector<32x3xf32> to vector<32x1xf32>
    %24 = vector.broadcast %23 : vector<32x1xf32> to vector<32x128xf32>
    %25 = arith.mulf %22, %24 : vector<32x128xf32>
    %26 = arith.addf %21, %25 : vector<32x128xf32>
    %27 = vector.extract_strided_slice %19 {offsets = [0, 2], sizes = [32, 128], strides = [1, 1]} : vector<32x132xf32> to vector<32x128xf32>
    %28 = vector.extract_strided_slice %20 {offsets = [0, 1], sizes = [32, 1], strides = [1, 1]} : vector<32x3xf32> to vector<32x1xf32>
    %29 = vector.broadcast %28 : vector<32x1xf32> to vector<32x128xf32>
    %30 = arith.mulf %27, %29 : vector<32x128xf32>
    %31 = arith.addf %26, %30 : vector<32x128xf32>
    %32 = vector.extract_strided_slice %19 {offsets = [0, 4], sizes = [32, 128], strides = [1, 1]} : vector<32x132xf32> to vector<32x128xf32>
    %33 = vector.extract_strided_slice %20 {offsets = [0, 2], sizes = [32, 1], strides = [1, 1]} : vector<32x3xf32> to vector<32x1xf32>
    %34 = vector.broadcast %33 : vector<32x1xf32> to vector<32x128xf32>
    %35 = arith.mulf %32, %34 : vector<32x128xf32>
    %36 = arith.addf %31, %35 : vector<32x128xf32>
    %c0_16 = arith.constant 0 : index
    %c0_17 = arith.constant 0 : index
    %37 = vector.load %arg7[%c0_16, %c0_17] : memref<32x1xf32, #tpu.memory_space<vmem>>, vector<32x1xf32>
    %38 = vector.broadcast %37 : vector<32x1xf32> to vector<32x128xf32>
    %39 = arith.addf %36, %38 : vector<32x128xf32>
    %40 = arith.negf %39 : vector<32x128xf32>
    %41 = math.exp %40 : vector<32x128xf32>
    %cst_18 = arith.constant 1.000000e+00 : f32
    %42 = vector.broadcast %cst_18 : f32 to vector<32x128xf32>
    %43 = arith.addf %42, %41 : vector<32x128xf32>
    %44 = arith.divf %42, %43 : vector<32x128xf32>
    %45 = arith.mulf %39, %44 : vector<32x128xf32>
    %c0_19 = arith.constant 0 : index
    %c0_20 = arith.constant 0 : index
    %46 = vector.load %arg8[%c0_19, %c0_20] : memref<8x32xf32, #tpu.memory_space<vmem>>, vector<8x32xf32>
    %cst_21 = arith.constant dense<0.000000e+00> : vector<8x128xf32>
    %47 = tpu.matmul %46, %45, %cst_21 {dimension_numbers = #tpu.dot_dimension_numbers<[1], [0], [0], [1], [0, 0, 1, 1], [], []>} : vector<8x32xf32>, vector<32x128xf32>, vector<8x128xf32> -> vector<8x128xf32>
    %c0_22 = arith.constant 0 : index
    %c0_23 = arith.constant 0 : index
    %48 = vector.load %arg9[%c0_22, %c0_23] : memref<8x1xf32, #tpu.memory_space<vmem>>, vector<8x1xf32>
    %49 = vector.broadcast %48 : vector<8x1xf32> to vector<8x128xf32>
    %50 = arith.addf %47, %49 : vector<8x128xf32>
    %51 = arith.negf %50 : vector<8x128xf32>
    %52 = math.exp %51 : vector<8x128xf32>
    %cst_24 = arith.constant 1.000000e+00 : f32
    %53 = vector.broadcast %cst_24 : f32 to vector<8x128xf32>
    %54 = arith.addf %53, %52 : vector<8x128xf32>
    %55 = arith.divf %53, %54 : vector<8x128xf32>
    %56 = arith.mulf %50, %55 : vector<8x128xf32>
    %c0_25 = arith.constant 0 : index
    %c0_26 = arith.constant 0 : index
    %57 = vector.load %arg10[%c0_25, %c0_26] : memref<32x8xf32, #tpu.memory_space<vmem>>, vector<32x8xf32>
    %cst_27 = arith.constant dense<0.000000e+00> : vector<32x128xf32>
    %58 = tpu.matmul %57, %56, %cst_27 {dimension_numbers = #tpu.dot_dimension_numbers<[1], [0], [0], [1], [0, 0, 1, 1], [], []>} : vector<32x8xf32>, vector<8x128xf32>, vector<32x128xf32> -> vector<32x128xf32>
    %c0_28 = arith.constant 0 : index
    %c0_29 = arith.constant 0 : index
    %59 = vector.load %arg11[%c0_28, %c0_29] : memref<32x1xf32, #tpu.memory_space<vmem>>, vector<32x1xf32>
    %60 = vector.broadcast %59 : vector<32x1xf32> to vector<32x128xf32>
    %61 = arith.addf %58, %60 : vector<32x128xf32>
    %62 = arith.negf %61 : vector<32x128xf32>
    %63 = math.exp %62 : vector<32x128xf32>
    %cst_30 = arith.constant 1.000000e+00 : f32
    %64 = vector.broadcast %cst_30 : f32 to vector<32x128xf32>
    %65 = arith.addf %64, %63 : vector<32x128xf32>
    %66 = arith.divf %64, %65 : vector<32x128xf32>
    %67 = arith.mulf %45, %66 : vector<32x128xf32>
    %c0_31 = arith.constant 0 : index
    %c0_32 = arith.constant 0 : index
    %68 = vector.load %arg12[%c0_31, %c0_32] : memref<8x32xf32, #tpu.memory_space<vmem>>, vector<8x32xf32>
    %cst_33 = arith.constant dense<0.000000e+00> : vector<8x128xf32>
    %69 = tpu.matmul %68, %67, %cst_33 {dimension_numbers = #tpu.dot_dimension_numbers<[1], [0], [0], [1], [0, 0, 1, 1], [], []>} : vector<8x32xf32>, vector<32x128xf32>, vector<8x128xf32> -> vector<8x128xf32>
    %c0_34 = arith.constant 0 : index
    %c0_35 = arith.constant 0 : index
    %70 = vector.load %arg13[%c0_34, %c0_35] : memref<8x1xf32, #tpu.memory_space<vmem>>, vector<8x1xf32>
    %71 = vector.broadcast %70 : vector<8x1xf32> to vector<8x128xf32>
    %72 = arith.addf %69, %71 : vector<8x128xf32>
    %73 = arith.addf %72, %6 : vector<8x128xf32>
    %c0_36 = arith.constant 0 : index
    %c0_37 = arith.constant 0 : index
    %c0_38 = arith.constant 0 : index
    %74 = vector.load %arg14[%c0_36, %c0_37, %c0_38] : memref<1x8x128xf32, #tpu.memory_space<vmem>>, vector<1x8x128xf32>
    %75 = vector.shape_cast %74 : vector<1x8x128xf32> to vector<8x128xf32>
    %76 = vector.shape_cast %73 : vector<8x128xf32> to vector<1x8x128xf32>
    tpu.vector_store %arg14[%c0_36, %c0_37, %c0_38], %76 {strides = array<i32>} : memref<1x8x128xf32, #tpu.memory_space<vmem>>, vector<1x8x128xf32>,
    return
  }
  func.func @transform_0(%arg0: i32) -> (i32, i32, i32) {
    %c0_i32 = arith.constant 0 : i32
    %c0_i32_0 = arith.constant 0 : i32
    %c0_i32_1 = arith.constant 0 : i32
    return %arg0, %c0_i32, %c0_i32_0 : i32, i32, i32
  }
  func.func @transform_1(%arg0: i32) -> (i32, i32) {
    %c0_i32 = arith.constant 0 : i32
    %c0_i32_0 = arith.constant 0 : i32
    %c0_i32_1 = arith.constant 0 : i32
    return %c0_i32, %c0_i32_0 : i32, i32
  }
  func.func @transform_2(%arg0: i32) -> (i32, i32) {
    %c0_i32 = arith.constant 0 : i32
    %c0_i32_0 = arith.constant 0 : i32
    %c0_i32_1 = arith.constant 0 : i32
    return %c0_i32, %c0_i32_0 : i32, i32
  }
  func.func @transform_3(%arg0: i32) -> (i32, i32) {
    %c0_i32 = arith.constant 0 : i32
    %c0_i32_0 = arith.constant 0 : i32
    %c0_i32_1 = arith.constant 0 : i32
    return %c0_i32, %c0_i32_0 : i32, i32
  }
  func.func @transform_4(%arg0: i32) -> (i32, i32) {
    %c0_i32 = arith.constant 0 : i32
    %c0_i32_0 = arith.constant 0 : i32
    %c0_i32_1 = arith.constant 0 : i32
    return %c0_i32, %c0_i32_0 : i32, i32
  }
  func.func @transform_5(%arg0: i32) -> (i32, i32) {
    %c0_i32 = arith.constant 0 : i32
    %c0_i32_0 = arith.constant 0 : i32
    %c0_i32_1 = arith.constant 0 : i32
    return %c0_i32, %c0_i32_0 : i32, i32
  }
  func.func @transform_6(%arg0: i32) -> (i32, i32) {
    %c0_i32 = arith.constant 0 : i32
    %c0_i32_0 = arith.constant 0 : i32
    %c0_i32_1 = arith.constant 0 : i32
    return %c0_i32, %c0_i32_0 : i32, i32
  }
  func.func @transform_7(%arg0: i32) -> (i32, i32) {
    %c0_i32 = arith.constant 0 : i32
    %c0_i32_0 = arith.constant 0 : i32
    %c0_i32_1 = arith.constant 0 : i32
    return %c0_i32, %c0_i32_0 : i32, i32
  }
  func.func @transform_8(%arg0: i32) -> (i32, i32) {
    %c0_i32 = arith.constant 0 : i32
    %c0_i32_0 = arith.constant 0 : i32
    %c0_i32_1 = arith.constant 0 : i32
    return %c0_i32, %c0_i32_0 : i32, i32
  }
  func.func @transform_9(%arg0: i32) -> (i32, i32) {
    %c0_i32 = arith.constant 0 : i32
    %c0_i32_0 = arith.constant 0 : i32
    %c0_i32_1 = arith.constant 0 : i32
    return %c0_i32, %c0_i32_0 : i32, i32
  }
  func.func @transform_10(%arg0: i32) -> (i32, i32) {
    %c0_i32 = arith.constant 0 : i32
    %c0_i32_0 = arith.constant 0 : i32
    %c0_i32_1 = arith.constant 0 : i32
    return %c0_i32, %c0_i32_0 : i32, i32
  }
  func.func @transform_11(%arg0: i32) -> (i32, i32) {
    %c0_i32 = arith.constant 0 : i32
    %c0_i32_0 = arith.constant 0 : i32
    %c0_i32_1 = arith.constant 0 : i32
    return %c0_i32, %c0_i32_0 : i32, i32
  }
  func.func @transform_12(%arg0: i32) -> (i32, i32) {
    %c0_i32 = arith.constant 0 : i32
    %c0_i32_0 = arith.constant 0 : i32
    %c0_i32_1 = arith.constant 0 : i32
    return %c0_i32, %c0_i32_0 : i32, i32
  }
  func.func @transform_13(%arg0: i32) -> (i32, i32, i32) {
    %c0_i32 = arith.constant 0 : i32
    %c0_i32_0 = arith.constant 0 : i32
    %c0_i32_1 = arith.constant 0 : i32
    return %arg0, %c0_i32, %c0_i32_0 : i32, i32, i32
  }
}

</mosaic_0001>

<bundles_post_ra>
// kernel: tpu_custom_call.1
= control target key start
LH: loop header
LB: loop body
LE: loop exit
PB: predicated region body
PF: predicated region fallthrough
CT: control target
= control target key end

     0   :  { %18 = vsyncpa [#allocation3], 0  ;;  %s1938_s0 = inlined_call_operand.vmem [shape: f32[2,8,128], index: 0, kind: input, shape index: {}]   ;;  %s1939_s1 = inlined_call_operand.vmem [shape: f32[8,8], index: 1, kind: input, shape index: {}]   ;;  %s1940_s2 = inlined_call_operand.vmem [shape: f32[8,1], index: 2, kind: input, shape index: {}]   ;;  %s1941_s3 = inlined_call_operand.vmem [shape: f32[32,8], index: 3, kind: input, shape index: {}]   ;;  %s1942_s4 = inlined_call_operand.vmem [shape: f32[32,1], index: 4, kind: input, shape index: {}]   ;;  %s1943_s5 = inlined_call_operand.vmem [shape: f32[32,3], index: 5, kind: input, shape index: {}]   ;;  %s1944_s6 = inlined_call_operand.vmem [shape: f32[32,1], index: 6, kind: input, shape index: {}]   ;;  %s1945_s7 = inlined_call_operand.vmem [shape: f32[8,32], index: 7, kind: input, shape index: {}]   ;;  %s1946_s8 = inlined_call_operand.vmem [shape: f32[8,1], index: 8, kind: input, shape index: {}]   ;;  %s1947_s9 = inlined_call_operand.vmem [shape: f32[32,8], index: 9, kind: input, shape index: {}]   ;;  %s1948_s10 = inlined_call_operand.vmem [shape: f32[32,1], index: 10, kind: input, shape index: {}]   ;;  %s1949_s11 = inlined_call_operand.vmem [shape: f32[8,32], index: 11, kind: input, shape index: {}]   ;;  %s1950_s12 = inlined_call_operand.vmem [shape: f32[8,1], index: 12, kind: input, shape index: {}]   ;;  %s1951_s13 = inlined_call_operand.hbm [shape: f32[2,8,128], index: 13, kind: output, shape index: {}]  }
   0x1   :  { %20 = vsyncpa [#allocation3 + $0x1], 0  ;;  %s1663_s25 = smov 0   ;;  %s1665_s26 = smov 0  }
   0x2   :  { %s1667_s27 = smov 0   ;;  %s1669_s28 = smov 0  }
   0x3 LB: > { %1955 = sst [smem:[#allocation5_spill]] %s1577_s27  ;;  %s1684_s29 = sadd.s32 4294967295, %s1581_s28   ;;  %s1581_s28 = sphi %s1669_s28, %s1960_s28   ;;  %s1577_s27 = sphi %s1667_s27, %s1962_s27   ;;  %s1573_s26 = sphi %s1665_s26, %s1964_s26   ;;  %s1569_s25 = sphi %s1663_s25, %s1963_s25  }
   0x4   : > { %s1298_s30 = sadd.s32 4294967294, %s1581_s28   ;;  %s1688_s14 = sadd.s32 1, %s1581_s28  }
   0x5   : > { %1956 = sst [smem:[#allocation6_spill]] %s1688_s14  ;;  %s311_s15 = sadd.s32 1, %s1577_s27 }
   0x6   : > { %s308_s16 = ssub.s32 %s1581_s28, %s1688_s14  ;;  %p321_p0 = scmp.ne.s32.totalorder %s1577_s27, %s1573_s26 }
   0x7   : > { %p309_p1 = scmp.eq.s32.totalorder %s308_s16, 0  ;;  %p322_p2 = scmp.eq.s32.totalorder %s1684_s29, 1 }
   0x8   : > { %p327_p3 = scmp.ne.s32.totalorder %s1573_s26, %s1569_s25  ;;  %p328_p4 = scmp.eq.s32.totalorder %s1298_s30, 1 }
   0x9   : > { %s1699_s17 = scalar_select %p309_p1, %s1577_s27, %s311_s15  }
   0xa   : > { %p1701_p5 = por %p322_p2, %p321_p0  ;;  %p1705_p6 = por %p328_p4, %p327_p3 }
   0xb   : > { %1957 = sst [smem:[#allocation7_spill]] %s1699_s17  ;;  %p1301_p7 = scmp.ge.s32.totalorder %s1581_s28, 1 }
   0xc   : > { %p389_p8 = scmp.lt.s32.totalorder %s1581_s28, 3 }
   0xe   : > { %p390_p9 = pnand %p1301_p7, %p389_p8 }
   0xf   : > { %p432_p10 = scmp.lt.s32.totalorder (!%p390_p9), %s1684_s29, 1  ;;  %v1583_v0 = vmov (!%p390_p9), 0.0   ;;  %vm1584_vm0 = vmmov (!%p390_p9), 0   ;;  %v438_v1 = vld [vmem:[%s1940_s2] sm:$0xff] (!%p390_p9)  ;;  %v1585_v2 = vmov (!%p390_p9), 0   ;;  %vm444_vm1 = vcmask (!%p390_p9), 64512  }
  0x10   : > { %393 = sbr.rel (%p390_p9) target bundleno = 1512 (0x5e8), region = 72  ;;  %1354 = vmatprep.subr.mxu0 (!%p390_p9), %v1583_v0  ;;  %1356 = vmatprep.mubr.msk.f32.mxu0 (!%p390_p9), %vm1584_vm0, %v1583_v0  ;;  %v522_v3 = vld [vmem:[%s1942_s4] sm:$0xff] (!%p390_p9)  ;;  %v525_v6 = vld [vmem:[%s1942_s4 + $0x18] sm:$0xff] (!%p390_p9)  ;;  %v523_v8 = vld [vmem:[%s1942_s4 + $0x8] sm:$0xff] (!%p390_p9)  ;;  %v1586_v10 = vmov (!%p390_p9), 1   ;;  %v1587_v13 = vmov (!%p390_p9), 2  }
  0x11   : > { %1457 = vset.pattern.permute.xlu0 (!%p390_p9), %v1585_v2  ;;  %1458 = vset.pattern.permute.xlu1 (!%p390_p9), %v1585_v2  ;;  %v437_v4 = vld [vmem:[%s1939_s1] sm:$0xff] (!%p390_p9)  ;;  %v1744_v9 = vld [vmem:[%s1943_s5 + $0x8] sm:$0xff] (!%p390_p9)  ;;  %v524_v11 = vld [vmem:[%s1942_s4 + $0x10] sm:$0xff] (!%p390_p9)  ;;  %s1588_s20 = smov (!%p390_p9), 4   ;;  %vm687_vm2 = vcmask (!%p390_p9), 31744   ;;  %s1589_s15 = smov (!%p390_p9), 126  }
  0x12   : > { %441 = vperm.xlu0 (!%p390_p9), %1457, %v438_v1   ;;  %v518_v7 = vld [vmem:[%s1941_s3] sm:$0xff] (!%p390_p9)  ;;  %533 = vperm.xlu1 (!%p390_p9), %1458, %v523_v8   ;;  %v519_v18 = vld [vmem:[%s1941_s3 + $0x8] sm:$0xff] (!%p390_p9)  ;;  %v520_v19 = vld [vmem:[%s1941_s3 + $0x10] sm:$0xff] (!%p390_p9)  ;;  %s1590_s16 = smov (!%p390_p9), 124   ;;  %vm772_vm3 = vcmask (!%p390_p9), 1031168   ;;  %vm833_vm4 = vcmask (!%p390_p9), 1014784  }
  0x13   : > { %1361 = vmatprep.mubr.msk.f32.mxu1 (!%p390_p9), %vm444_vm1, %v518_v7  ;;  %v1753_v12 = vld [vmem:[%s1943_s5] sm:$0xff] (!%p390_p9)  ;;  %v521_v20 = vld [vmem:[%s1941_s3 + $0x18] sm:$0xff] (!%p390_p9)  ;;  %v694_v22 = vld [vmem:[%s1943_s5 + $0x10] sm:$0xff] (!%p390_p9)  ;;  %vm909_vm5 = vcmask (!%p390_p9), 261120   ;;  %s1329_s27 = sshll.u32 (!%p390_p9), %s1684_s29, 7 }
  0x14   : > { %v695_v21 = vld [vmem:[%s1943_s5 + $0x18] sm:$0xff] (!%p390_p9)  ;;  %v846_v55 = vld [vmem:[%s1944_s6] sm:$0xff] (!%p390_p9)  ;;  %v848_v56 = vld [vmem:[%s1944_s6 + $0x10] sm:$0xff] (!%p390_p9) }
  0x15   : > { %v847_v57 = vld [vmem:[%s1944_s6 + $0x8] sm:$0xff] (!%p390_p9)  ;;  %v849_v58 = vld [vmem:[%s1944_s6 + $0x18] sm:$0xff] (!%p390_p9) }
  0x16   : > { %528 = vperm.xlu0 (!%p390_p9), %1457, %v522_v3   ;;  %538 = vperm.xlu1 (!%p390_p9), %1458, %v524_v11  }
  0x17   : > { %s433_s22 = scalar_select %p432_p10, %s1684_s29, 1 }
  0x18   : > { %s1592_s29 = smov [#allocation2]  }
  0x19   : > { %s1303_s23 = sshll.u32 %s433_s22, 3  ;;  %s429_s22 = sand.u32 1, %s1573_s26  }
  0x1a   : > { %s435_s17 = scalar_lea.vmem %s1938_s0, %s1303_s23  ;;  %543 = vperm.xlu0 %1457, %v525_v6   ;;  %1459 = vset.pattern.permute.xlu1 %v1586_v10  ;;  %s1302_s23 = sshll.u32 %s429_s22, 3 }
  0x1b   : > { %v436_v5 = vld [vmem:[%s435_s17] sm:$0xff]  ;;  %725 = vperm.xlu1 %1459, %v1753_v12   ;;  %s431_s14 = scalar_lea.vmem [#allocation2], %s1302_s23  ;;  %s1523_s21 = sshll.u32 %s1592_s29, 4  ;;  %s1524_s21 = int_to_ptr.vmem [resolvable:$false] %s1523_s21 }
  0x1c   : > { %1355 = vmatpush3.msra.mxu0 %v436_v5  ;;  %s1239_s17 = sshll.u32 %s431_s14, 4  ;;  %s1525_s23 = scalar_lea.vmem %s1524_s21, 256  ;;  %s1898_s17 = int_to_ptr.vmem [resolvable:$true] %s1239_s17 }
  0x1d   : > { %1357 = vmatmul.mubr.msk.f32.vlgmr.msra.gmra.mrb[0].mxu0 %vm444_vm1, %v437_v4  ;;  %p1526_p0 = scmp.lt.s32.totalorder %s1898_s17, %s1524_s21 }
  0x1e   : > { %1375 = vmatprep.mubr.msk.f32.mxu0 %vm1584_vm0, %v1583_v0  ;;  %1460 = vset.pattern.permute.xlu0 %v1586_v10 }
  0x1f   : > { %729 = vperm.xlu0 %1460, %v1744_v9   ;;  %1461 = vset.pattern.permute.xlu1 %v1587_v13 }
  0x20   : > { %786 = vperm.xlu1 %1461, %v1753_v12  }
  0x23   : > { %733 = vperm.xlu0 %1460, %v694_v22  }
  0x24   : > { %790 = vperm.xlu1 %1461, %v1744_v9  }
  0x27   : > { %1463 = vset.pattern.permute.xlu0 %v1587_v13 }
  0x28   : > { %1462 = vset.pattern.permute.xlu1 %v1586_v10  ;;  %794 = vperm.xlu0 %1463, %v694_v22  }
  0x29   : > { %737 = vperm.xlu1 %1462, %v695_v21  }
  0x2c   : > { %1466 = vset.pattern.permute.xlu0 %v1585_v2 }
  0x2d   : > { %1464 = vset.pattern.permute.xlu1 %v1587_v13 }
  0x2e   : > { %798 = vperm.xlu1 %1464, %v695_v21  }
  0x32   : > { %1465 = vset.pattern.permute.xlu1 %v1585_v2 }
  0x91   : > { %v442_v14 = vpop.permute.xlu0 %441  ;;  %v534_v24 = vpop.permute.xlu1 %533 }
  0x95   : > { %v529_v23 = vpop.permute.xlu0 %528  ;;  %v539_v33 = vpop.permute.xlu1 %538 }
  0x99   : > { %v544_v30 = vpop.permute.xlu0 %543 }
  0x9a   : > { %v726_v59 = vpop.permute.xlu1 %725 }
  0x9e   : > { %v730_v62 = vpop.permute.xlu0 %729 }
  0x9f   : > { %v787_v60 = vpop.permute.xlu1 %786 }
  0xa2   : > { %v734_v1 = vpop.permute.xlu0 %733 }
  0xa3   : > { %v791_v61 = vpop.permute.xlu1 %790 }
  0xa7   : > { %v795_v3 = vpop.permute.xlu0 %794 }
  0xa8   : > { %v738_v63 = vpop.permute.xlu1 %737 }
  0xad   : > { %v799_v2 = vpop.permute.xlu1 %798 }
  0xf0   : > { %v514_v15 = vpop.f32.mrb[0].mxu0 }
  0xf1   : > { %v1758_v16 = vadd.f32 %v514_v15, %v442_v14  ;;  %v1358_v17 = vpop.f32.mrb[1].mxu0 }
  0xf3   : > { %1359 = vmatprep.subr.mxu1 %v1758_v16 }
  0xf4   : > { %1360 = vmatpush3.msra.mxu1 %v1758_v16 }
  0xf5   : > { %1362 = vmatmul.mubr.msk.f32.vlgmr.msra.gmra.mrb[0].mxu1 %vm444_vm1, %v519_v18 }
  0xf6   : > { %1364 = vmatprep.mubr.msk.f32.mxu1 %vm444_vm1, %v520_v19 }
  0xf9   : > { %1365 = vmatmul.mubr.msk.f32.gmra.mrb[2].mxu1 %vm444_vm1, %v521_v20 }
 0x1c8   : > { %v1363_v25 = vpop.f32.mrb[0].mxu1 }
 0x1c9   : > { %v630_v26 = vadd.f32 %v1363_v25, %v534_v24  ;;  %v624_v27 = vpop.f32.mrb[1].mxu1 }
 0x1ca   : > { %v625_v28 = vadd.f32 %v624_v27, %v529_v23 }
 0x1cb   : > { %v1310_v29 = vmul.f32 -1.442695, %v630_v26 }
 0x1cc   : > { %v1309_v31 = vmul.f32 -1.442695, %v625_v28  ;;  %v1366_v32 = vpop.f32.mrb[2].mxu1 }
 0x1cd   : > { %1467 = vpow2.f32 %v1310_v29  ;;  %v640_v34 = vadd.f32 %v1366_v32, %v544_v30  ;;  %v634_v35 = vpop.f32.mrb[3].mxu1  ;;  %v994_v29 = vld [vmem:[%s1948_s10] sm:$0xff]  ;;  %v995_v32 = vld [vmem:[%s1948_s10 + $0x8] sm:$0xff] }
 0x1ce   : > { %1469 = vpow2.f32 %v1309_v31  ;;  %v635_v36 = vadd.f32 %v634_v35, %v539_v33  ;;  %v903_v30 = vld [vmem:[%s1946_s8] sm:$0xff]  ;;  %v996_v31 = vld [vmem:[%s1948_s10 + $0x10] sm:$0xff]  ;;  %v1591_v33 = vmov 0.0|0.0   ;;  %v997_v35 = vld [vmem:[%s1948_s10 + $0x18] sm:$0xff] }
 0x1cf   : > { %v1312_v37 = vmul.f32 -1.442695, %v640_v34  ;;  %1397 = vmatprep.subr.bf16.mxu0 %v1591_v33 }
 0x1d0   : > { %v1311_v38 = vmul.f32 -1.442695, %v635_v36 }
 0x1d1   : > { %1471 = vpow2.f32 %v1312_v37 }
 0x1d2   : > { %1473 = vpow2.f32 %v1311_v38 }
 0x1d7   : > { %v1468_v39 = vpop.eup %1467 }
 0x1d8   : > { %v1470_v40 = vpop.eup %1469  ;;  %v656_v41 = vadd.f32 1.0, %v1468_v39 }
 0x1d9   : > { %v655_v42 = vadd.f32 1.0, %v1470_v40 }
 0x1da   : > { %1475 = vrcp.f32 %v656_v41 }
 0x1db   : > { %v1472_v43 = vpop.eup %1471  ;;  %1477 = vrcp.f32 %v655_v42 }
 0x1dc   : > { %v1474_v44 = vpop.eup %1473  ;;  %v658_v45 = vadd.f32 1.0, %v1472_v43 }
 0x1dd   : > { %v657_v46 = vadd.f32 1.0, %v1474_v44 }
 0x1de   : > { %1479 = vrcp.f32 %v658_v45 }
 0x1df   : > { %1481 = vrcp.f32 %v657_v46 }
 0x1e4   : > { %v1476_v47 = vpop.eup %1475 }
 0x1e5   : > { %v1478_v48 = vpop.eup %1477  ;;  %v668_v49 = vmul.f32 %v1476_v47, %v630_v26 }
 0x1e6   : > { %v667_v50 = vmul.f32 %v1478_v48, %v625_v28 }
 0x1e7   : > { %677 = vrot.lane.b32.xlu1 %v668_v49, %s1588_s20 }
 0x1e8   : > { %v1480_v51 = vpop.eup %1479  ;;  %675 = vrot.lane.b32.xlu0 %v667_v50, %s1588_s20 }
 0x1e9   : > { %v1482_v52 = vpop.eup %1481  ;;  %v670_v53 = vmul.f32 %v1480_v51, %v640_v34  ;;  %v1144_v34 = vld [vmem:[%s1950_s12] sm:$0xff] }
 0x1ea   : > { %v669_v54 = vmul.f32 %v1482_v52, %v635_v36 }
 0x1ec   : > { %679 = vrot.lane.b32.xlu1 %v669_v54, %s1588_s20  ;;  %681 = vrot.lane.b32.xlu0 %v670_v53, %s1588_s20  ;;  %s1519_s20 = scalar_lea.vmem %s1898_s17, 128 }
 0x1ed   : > { %p1520_p11 = scmp.ne.s32.totalorder %s1898_s17, %s1519_s20  ;;  %p1527_p1 = scmp.lt.s32.totalorder %s1525_s23, %s1519_s20 }
 0x1ef   : > { %p1521_p12 = pnand %p1520_p11, %p1701_p5  ;;  %p1528_p2 = por %p1527_p1, %p1526_p0 }
 0x1f0   : > { %698 = vperm.xlu1 %1465, %v1753_v12   ;;  %703 = vperm.xlu0 %1466, %v1744_v9  }
 0x1f1   : > { %p1522_p13 = pneg %p1521_p12 }
 0x1f3   : > { %p1529_p3 = pnand %p1528_p2, %p1522_p13 }
 0x1f4   : > { %708 = vperm.xlu1 %1465, %v694_v22   ;;  %852 = vperm.xlu0 %1466, %v846_v55  }
 0x1f8   : > { %713 = vperm.xlu1 %1465, %v695_v21   ;;  %862 = vperm.xlu0 %1466, %v848_v56  }
 0x1fc   : > { %857 = vperm.xlu1 %1465, %v847_v57  }
 0x200   : > { %867 = vperm.xlu1 %1465, %v849_v58  }
 0x259   : > { %v678_v4 = vpop.permute.xlu1 %677 }
 0x25a   : > { %v1795_v5 = vsel %vm687_vm2, 0.0, %v678_v4  ;;  %v743_v6 = vmul.f32 %v730_v62, %v678_v4  ;;  %v676_v8 = vpop.permute.xlu0 %675  ;;  %v804_v9 = vmul.f32 %v791_v61, %v678_v4 }
 0x25b   : > { %v742_v7 = vmul.f32 %v730_v62, %v1795_v5  ;;  %v803_v10 = vmul.f32 %v791_v61, %v1795_v5  ;;  %v1800_v11 = vsel %vm687_vm2, 0.0, %v676_v8  ;;  %v741_v12 = vmul.f32 %v726_v59, %v676_v8 }
 0x25c   : > { %762 = vrot.lane.b32.xlu1 %v743_v6, %s1589_s15  ;;  %v740_v13 = vmul.f32 %v726_v59, %v1800_v11  ;;  %v802_v15 = vmul.f32 %v787_v60, %v676_v8  ;;  %v801_v17 = vmul.f32 %v787_v60, %v1800_v11 }
 0x25d   : > { %760 = vrot.lane.b32.xlu0 %v742_v7, %s1589_s15 }
 0x25e   : > { %v682_v14 = vpop.permute.xlu0 %681  ;;  %v680_v19 = vpop.permute.xlu1 %679 }
 0x25f   : > { %v1805_v18 = vsel %vm687_vm2, 0.0, %v682_v14  ;;  %v747_v20 = vmul.f32 %v738_v63, %v682_v14  ;;  %v1809_v22 = vsel %vm687_vm2, 0.0, %v680_v19  ;;  %v745_v23 = vmul.f32 %v734_v1, %v680_v19 }
 0x260   : > { %823 = vrot.lane.b32.xlu1 %v804_v9, %s1590_s16  ;;  %v746_v21 = vmul.f32 %v738_v63, %v1805_v18  ;;  %v744_v24 = vmul.f32 %v734_v1, %v1809_v22  ;;  %v806_v25 = vmul.f32 %v795_v3, %v680_v19  ;;  %v805_v26 = vmul.f32 %v795_v3, %v1809_v22 }
 0x261   : > { %821 = vrot.lane.b32.xlu0 %v803_v10, %s1590_s16  ;;  %v808_v27 = vmul.f32 %v799_v2, %v682_v14  ;;  %v807_v28 = vmul.f32 %v799_v2, %v1805_v18 }
 0x264   : > { %758 = vrot.lane.b32.xlu1 %v741_v12, %s1589_s15 }
 0x265   : > { %756 = vrot.lane.b32.xlu0 %v740_v13, %s1589_s15 }
 0x268   : > { %819 = vrot.lane.b32.xlu1 %v802_v15, %s1590_s16 }
 0x269   : > { %817 = vrot.lane.b32.xlu0 %v801_v17, %s1590_s16 }
 0x26c   : > { %770 = vrot.lane.b32.xlu1 %v747_v20, %s1589_s15 }
 0x26d   : > { %768 = vrot.lane.b32.xlu0 %v746_v21, %s1589_s15 }
 0x26f   : > { %v699_v36 = vpop.permute.xlu1 %698  ;;  %v704_v39 = vpop.permute.xlu0 %703 }
 0x270   : > { %766 = vrot.lane.b32.xlu1 %v745_v23, %s1589_s15  ;;  %v717_v47 = vmul.f32 %v704_v39, %v1795_v5  ;;  %v716_v57 = vmul.f32 %v699_v36, %v1800_v11 }
 0x271   : > { %764 = vrot.lane.b32.xlu0 %v744_v24, %s1589_s15  ;;  %s1896_s15 = scalar_lea.hbm %s1951_s13, %s1329_s27 }
 0x273   : > { %v709_v37 = vpop.permute.xlu1 %708  ;;  %v853_v41 = vpop.permute.xlu0 %852 }
 0x274   : > { %827 = vrot.lane.b32.xlu1 %v806_v25, %s1590_s16  ;;  %v718_v8 = vmul.f32 %v709_v37, %v1809_v22 }
 0x275   : > { %825 = vrot.lane.b32.xlu0 %v805_v26, %s1590_s16 }
 0x277   : > { %v714_v38 = vpop.permute.xlu1 %713  ;;  %v863_v43 = vpop.permute.xlu0 %862 }
 0x278   : > { %831 = vrot.lane.b32.xlu1 %v808_v27, %s1590_s16  ;;  %v719_v15 = vmul.f32 %v714_v38, %v1805_v18 }
 0x279   : > { %829 = vrot.lane.b32.xlu0 %v807_v28, %s1590_s16  ;;  %s1226_s16 = scalar_lea.sflag [#allocation3], %s429_s22 }
 0x27b   : > { %v858_v40 = vpop.permute.xlu1 %857 }
 0x27c   : > { %1000 = vperm.xlu1 %1465, %v994_v29  }
 0x27d   : > { %906 = vperm.xlu0 %1466, %v903_v30  }
 0x27f   : > { %v868_v42 = vpop.permute.xlu1 %867 }
 0x280   : > { %1010 = vperm.xlu1 %1465, %v996_v31  }
 0x281   : > { %1005 = vperm.xlu0 %1466, %v995_v32  }
 0x284   : > { %1147 = vperm.xlu1 %1465, %v1144_v34  }
 0x285   : > { %1015 = vperm.xlu0 %1466, %v997_v35  }
 0x2ce   : > { %v763_v44 = vpop.permute.xlu1 %762 }
 0x2cf   : > { %v761_v45 = vpop.permute.xlu0 %760 }
 0x2d0   : > { %v774_v46 = vsel %vm772_vm3, %v761_v45, %v763_v44  ;;  %v902_v45 = vld [vmem:[%s1945_s7] sm:$0xff] }
 0x2d1   : > { %v782_v49 = vadd.f32 %v774_v46, %v717_v47  ;;  %v990_v46 = vld [vmem:[%s1947_s9] sm:$0xff] }
 0x2d2   : > { %v824_v48 = vpop.permute.xlu1 %823  ;;  %1380 = vmatprep.mubr.msk.f32.mxu1 %vm444_vm1, %v990_v46 }
 0x2d3   : > { %v822_v50 = vpop.permute.xlu0 %821 }
 0x2d4   : > { %v835_v51 = vsel %vm833_vm4, %v822_v50, %v824_v48 }
 0x2d5   : > { %v843_v52 = vadd.f32 %v835_v51, %v782_v49 }
 0x2d6   : > { %v759_v53 = vpop.permute.xlu1 %758 }
 0x2d7   : > { %v871_v54 = vadd.f32 %v858_v40, %v843_v52  ;;  %v757_v55 = vpop.permute.xlu0 %756 }
 0x2d8   : > { %v773_v56 = vsel %vm772_vm3, %v757_v55, %v759_v53 }
 0x2d9   : > { %v1314_v58 = vmul.f32 -1.442695, %v871_v54  ;;  %v781_v60 = vadd.f32 %v773_v56, %v716_v57  ;;  %v992_v56 = vld [vmem:[%s1947_s9 + $0x10] sm:$0xff]  ;;  %v993_v57 = vld [vmem:[%s1947_s9 + $0x18] sm:$0xff] }
 0x2da   : > { %v820_v59 = vpop.permute.xlu1 %819 }
 0x2db   : > { %v818_v61 = vpop.permute.xlu0 %817  ;;  %1483 = vpow2.f32 %v1314_v58 }
 0x2dc   : > { %v834_v62 = vsel %vm833_vm4, %v818_v61, %v820_v59 }
 0x2dd   : > { %v842_v63 = vadd.f32 %v834_v62, %v781_v60 }
 0x2de   : > { %v771_v1 = vpop.permute.xlu1 %770 }
 0x2df   : > { %v870_v2 = vadd.f32 %v853_v41, %v842_v63  ;;  %v769_v3 = vpop.permute.xlu0 %768 }
 0x2e0   : > { %v776_v13 = vsel %vm772_vm3, %v769_v3, %v771_v1 }
 0x2e1   : > { %v1313_v4 = vmul.f32 -1.442695, %v870_v2  ;;  %v784_v21 = vadd.f32 %v776_v13, %v719_v15 }
 0x2e2   : > { %v767_v5 = vpop.permute.xlu1 %766 }
 0x2e3   : > { %1485 = vpow2.f32 %v1313_v4  ;;  %v765_v6 = vpop.permute.xlu0 %764 }
 0x2e4   : > { %v775_v7 = vsel %vm772_vm3, %v765_v6, %v767_v5 }
 0x2e5   : > { %v1484_v10 = vpop.eup %1483  ;;  %v783_v11 = vadd.f32 %v775_v7, %v718_v8 }
 0x2e6   : > { %v828_v9 = vpop.permute.xlu1 %827  ;;  %v887_v19 = vadd.f32 1.0, %v1484_v10 }
 0x2e7   : > { %v826_v12 = vpop.permute.xlu0 %825 }
 0x2e8   : > { %v836_v14 = vsel %vm833_vm4, %v826_v12, %v828_v9  ;;  %1487 = vrcp.f32 %v887_v19 }
 0x2e9   : > { %v844_v17 = vadd.f32 %v836_v14, %v783_v11 }
 0x2ea   : > { %v832_v20 = vpop.permute.xlu1 %831 }
 0x2eb   : > { %v872_v23 = vadd.f32 %v863_v43, %v844_v17  ;;  %v830_v24 = vpop.permute.xlu0 %829 }
 0x2ec   : > { %v837_v25 = vsel %vm833_vm4, %v830_v24, %v832_v20 }
 0x2ed   : > { %v1486_v26 = vpop.eup %1485  ;;  %v1315_v22 = vmul.f32 -1.442695, %v872_v23  ;;  %v845_v27 = vadd.f32 %v837_v25, %v784_v21 }
 0x2ee   : > { %v886_v28 = vadd.f32 1.0, %v1486_v26 }
 0x2ef   : > { %1489 = vpow2.f32 %v1315_v22  ;;  %v873_v29 = vadd.f32 %v868_v42, %v845_v27 }
 0x2f0   : > { %1491 = vrcp.f32 %v886_v28 }
 0x2f1   : > { %v1316_v30 = vmul.f32 -1.442695, %v873_v29 }
 0x2f2   : > { %v1488_v31 = vpop.eup %1487 }
 0x2f3   : > { %1493 = vpow2.f32 %v1316_v30  ;;  %v1845_v35 = vmul.f32 %v1488_v31, %v871_v54  ;;  %v1143_v31 = vld [vmem:[%s1949_s11] sm:$0xff] }
 0x2f9   : > { %v1490_v18 = vpop.eup %1489 }
 0x2fa   : > { %v1492_v32 = vpop.eup %1491  ;;  %v888_v34 = vadd.f32 1.0, %v1490_v18 }
 0x2fb   : > { %v1847_v36 = vmul.f32 %v1492_v32, %v870_v2  ;;  %v1001_v59 = vpop.permute.xlu1 %1000 }
 0x2fc   : > { %1495 = vrcp.f32 %v888_v34  ;;  %v907_v47 = vpop.permute.xlu0 %906 }
 0x2fd   : > { %v1494_v37 = vpop.eup %1493  ;;  %v1398_v38 = vpack.c.bf16 %v1845_v35, %v1847_v36 }
 0x2fe   : > { %v889_v39 = vadd.f32 1.0, %v1494_v37 }
 0x2ff   : > { %1399 = vmatpush3.bf16.msra.mxu0 %v1398_v38  ;;  %v1011_v5 = vpop.permute.xlu1 %1010 }
 0x300   : > { %1497 = vrcp.f32 %v889_v39  ;;  %1400 = vmatprep.subr.bf16.mxu0 %v1591_v33  ;;  %v1006_v58 = vpop.permute.xlu0 %1005 }
 0x303   : > { %v1148_v18 = vpop.permute.xlu1 %1147 }
 0x304   : > { %v1016_v2 = vpop.permute.xlu0 %1015 }
 0x306   : > { %v1496_v40 = vpop.eup %1495 }
 0x307   : > { %v1852_v42 = vmul.f32 %v1496_v40, %v872_v23 }
 0x30a   : > { %v1498_v41 = vpop.eup %1497 }
 0x30b   : > { %v1854_v43 = vmul.f32 %v1498_v41, %v873_v29 }
 0x30d   : > { %v1401_v44 = vpack.c.bf16 %v1854_v43, %v1852_v42 }
 0x30f   : > { %1402 = vmatpush3.bf16.msra.mxu0 %v1401_v44 }
 0x310   : > { %1403 = vmatprep.subr.bf16.mxu0 %v1591_v33 }
 0x312   : > { %1376 = vmatmul.mubr.msk.f32.vlgmr.msra.gmra.mrb[2].mxu0 %vm909_vm5, %v902_v45 }
 0x313   : > { %1394 = vmatprep.mubr.msk.f32.mxu0 %vm1584_vm0, %v1583_v0  ;;  %v991_v0 = vld [vmem:[%s1947_s9 + $0x8] sm:$0xff] }
 0x3e5   : > { %v979_v48 = vpop.f32.mrb[2].mxu0 }
 0x3e6   : > { %v980_v49 = vadd.f32 %v979_v48, %v907_v47  ;;  %v1377_v50 = vpop.f32.mrb[3].mxu0 }
 0x3e8   : > { %v1318_v51 = vmul.f32 -1.442695, %v980_v49 }
 0x3ea   : > { %1499 = vpow2.f32 %v1318_v51 }
 0x3f4   : > { %v1500_v52 = vpop.eup %1499 }
 0x3f5   : > { %v986_v53 = vadd.f32 1.0, %v1500_v52 }
 0x3f7   : > { %1501 = vrcp.f32 %v986_v53 }
 0x401   : > { %v1502_v54 = vpop.eup %1501 }
 0x402   : > { %v989_v55 = vmul.f32 %v1502_v54, %v980_v49 }
 0x404   : > { %1378 = vmatprep.subr.mxu1 %v989_v55 }
 0x405   : > { %1379 = vmatpush3.msra.mxu1 %v989_v55 }
 0x406   : > { %1381 = vmatmul.mubr.msk.f32.vlgmr.msra.gmra.mrb[4].mxu1 %vm444_vm1, %v991_v0 }
 0x407   : > { %1383 = vmatprep.mubr.msk.f32.mxu1 %vm444_vm1, %v992_v56 }
 0x40a   : > { %1384 = vmatmul.mubr.msk.f32.gmra.mrb[6].mxu1 %vm444_vm1, %v993_v57 }
 0x4d9   : > { %v1382_v60 = vpop.f32.mrb[4].mxu1 }
 0x4da   : > { %v1102_v61 = vadd.f32 %v1382_v60, %v1006_v58  ;;  %v1096_v62 = vpop.f32.mrb[5].mxu1 }
 0x4db   : > { %v1097_v63 = vadd.f32 %v1096_v62, %v1001_v59 }
 0x4dc   : > { %v1324_v1 = vmul.f32 -1.442695, %v1102_v61 }
 0x4dd   : > { %v1323_v3 = vmul.f32 -1.442695, %v1097_v63  ;;  %v1385_v4 = vpop.f32.mrb[6].mxu1 }
 0x4de   : > { %1503 = vpow2.f32 %v1324_v1  ;;  %v1112_v6 = vadd.f32 %v1385_v4, %v1016_v2  ;;  %v1106_v7 = vpop.f32.mrb[7].mxu1 }
 0x4df   : > { %1505 = vpow2.f32 %v1323_v3  ;;  %v1107_v8 = vadd.f32 %v1106_v7, %v1011_v5 }
 0x4e0   : > { %v1326_v9 = vmul.f32 -1.442695, %v1112_v6 }
 0x4e1   : > { %v1325_v10 = vmul.f32 -1.442695, %v1107_v8 }
 0x4e2   : > { %1507 = vpow2.f32 %v1326_v9 }
 0x4e3   : > { %1509 = vpow2.f32 %v1325_v10 }
 0x4e8   : > { %v1504_v11 = vpop.eup %1503 }
 0x4e9   : > { %v1506_v12 = vpop.eup %1505  ;;  %v1128_v13 = vadd.f32 1.0, %v1504_v11 }
 0x4ea   : > { %v1127_v14 = vadd.f32 1.0, %v1506_v12 }
 0x4eb   : > { %1511 = vrcp.f32 %v1128_v13 }
 0x4ec   : > { %v1508_v15 = vpop.eup %1507  ;;  %1513 = vrcp.f32 %v1127_v14 }
 0x4ed   : > { %v1510_v17 = vpop.eup %1509  ;;  %v1130_v19 = vadd.f32 1.0, %v1508_v15 }
 0x4ee   : > { %v1129_v20 = vadd.f32 1.0, %v1510_v17 }
 0x4ef   : > { %1515 = vrcp.f32 %v1130_v19 }
 0x4f0   : > { %1517 = vrcp.f32 %v1129_v20 }
 0x4f5   : > { %v1512_v21 = vpop.eup %1511 }
 0x4f6   : > { %v1514_v23 = vpop.eup %1513  ;;  %v1140_v24 = vmul.f32 %v1512_v21, %v1845_v35 }
 0x4f7   : > { %v1139_v25 = vmul.f32 %v1514_v23, %v1847_v36 }
 0x4f9   : > { %v1516_v26 = vpop.eup %1515  ;;  %v1404_v22 = vpack.c.bf16 %v1140_v24, %v1139_v25 }
 0x4fa   : > { %v1518_v27 = vpop.eup %1517  ;;  %v1142_v28 = vmul.f32 %v1516_v26, %v1854_v43 }
 0x4fb   : > { %1405 = vmatpush3.bf16.msra.mxu0 %v1404_v22  ;;  %v1141_v29 = vmul.f32 %v1518_v27, %v1852_v42 }
 0x4fc   : > { %1406 = vmatprep.subr.bf16.mxu0 %v1591_v33 }
 0x4fd   : > { %v1407_v30 = vpack.c.bf16 %v1142_v28, %v1141_v29 }
 0x4ff   : > { %1408 = vmatpush3.bf16.msra.mxu0 %v1407_v30 }
 0x502   : > { %1395 = vmatmul.mubr.msk.f32.vlgmr.msra.gmra.mrb[4].mxu0 %vm909_vm5, %v1143_v31 }
 0x5d5   : > { %v1219_v32 = vpop.f32.mrb[4].mxu0 }
 0x5d6   : > { %v1220_v34 = vadd.f32 %v1219_v32, %v1148_v18  ;;  %v1396_v35 = vpop.f32.mrb[5].mxu0 }
 0x5d8   : > { %v1223_v33 = vadd.f32 %v1220_v34, %v1758_v16 }
 0x5da   : > { %1224 = vst [vmem:[%s431_s14] sm:$0xff] %v1223_v33 }
 0x5db   : > { %1532 = shalt.err (!%p1529_p3)
}
 0x5dc   : > { %s1533_s22 = scalar_lea.hbm %s1896_s15, 128  ;;  %s1537_s24 = scalar_lea.hbm %s1951_s13, 256 }
 0x5dd   : > { %p1534_p4 = scmp.ne.s32.totalorder %s1896_s15, %s1533_s22  ;;  %p1538_p9 = scmp.lt.u32.totalorder %s1896_s15, %s1951_s13 }
 0x5de   : > { %p1539_p10 = scmp.lt.u32.totalorder %s1537_s24, %s1533_s22  ;;  %p1541_p12 = scmp.lt.u32.totalorder %s1533_s22, %s1896_s15 }
 0x5df   : > { %p1535_p7 = pnand %p1534_p4, %p1701_p5 }
 0x5e0   : > { %p1540_p11 = por %p1539_p10, %p1538_p9 }
 0x5e1   : > { %p1536_p8 = pneg %p1535_p7 }
 0x5e2   : > { %p1542_p13 = por %p1541_p12, %p1540_p11 }
 0x5e4   : > { %p1543_p0 = pnand %p1542_p13, %p1536_p8 }
 0x5e6   : > { %1546 = shalt.err (!%p1543_p0)
}
 0x5e7   : > { %1409 = dma.vmem_to_hbm [thread:$0]  (%p1701_p5), %s1898_s17, 128, %s1896_s15, %s1226_s16  }
 0x5e8 PF: > { %p1415_p1 = scmp.ge.s32.totalorder %s1581_s28, 2  ;;  %s1251_s20 = sand.u32 1, %s1569_s25  }
 0x5e9   : > { %s1252_s21 = scalar_lea.sflag [#allocation3], %s1251_s20 }
 0x5ea   : > { %p1412_p2 = pnand %p1415_p1, %p1705_p6 }
 0x5ec   : > { %1564 = dma.done.wait (!%p1412_p2), %s1252_s21, 128  }
 0x5ed   : > { %1566 = vsyncadd (!%p1412_p2), %s1252_s21, 4294967168  ;;  %s1960_s28 = sld [smem:[#allocation6_spill]]  ;;  %s1961_s23 = sld [smem:[#allocation5_spill]] }
 0x5ee   : > { %s1962_s27 = sld [smem:[#allocation7_spill]]  ;;  %s1963_s25 = smov %s1573_s26 }
 0x5f3   : > { %p23_p3 = scmp.ge.s32.totalorder %s1960_s28, 4   ;;  %s1964_s26 = smov %s1961_s23 }
 0x5f5   :  { %25 = sbr.rel (!%p23_p3) target bundleno = 3 (0x3), region = 107 }
 0x5fc   :  { %1257 = vsyncpa [#allocation3], 1 }
 0x5fd   :  { %1259 = vsyncpa [#allocation3 + $0x1], 1 }

</bundles_post_ra>
